<compile_context>
chip_gen: v5e
topology: v5e:2x2
jax: 0.10.0
libtpu: 0.0.40
codegen_flags: <defaults>
</compile_context>

<pallas_src>
import functools
import math
from typing import NamedTuple

import jax
import jax.numpy as jnp
from jax.experimental import pallas as pl
from jax.experimental.pallas import tpu as pltpu


def _round_up(x, m):
    return ((x + m - 1) // m) * m


def _gelu_tanh(x):
    # PyTorch F.gelu(..., approximate='tanh')
    c = math.sqrt(2.0 / math.pi)
    return 0.5 * x * (1.0 + jnp.tanh(c * (x + 0.044715 * x * x * x)))


def _vmem_budget_bytes():
    """Usable VMEM budget: ~80% of physical capacity (never request the whole thing)."""
    cap = 64 << 20  # conservative fallback: v7x per-TensorCore VMEM
    try:
        info = pltpu.get_tpu_info()
        c = getattr(info, "vmem_capacity_bytes", None)
        if c:
            cap = int(c)
    except Exception:
        pass
    # ~51 MiB on v7x (64 MiB phys), ~102 MiB on v5e/v6e (128 MiB phys): leaves headroom
    # for Mosaic internal scratch (MXU result staging etc.).
    return (cap * 4) // 5


def _tile_vmem_bytes(tm, ti, H, x_isz, w_isz, out_isz, wbuf):
    """Honest per-tile VMEM estimate, including f32 intermediates."""
    return (2 * tm * H * x_isz             # x row tile (double buffered)
            + wbuf * H * 2 * ti * w_isz    # fused [gate|up] weight stream
            + wbuf * ti * H * w_isz        # down-proj weight stream
            + 2 * tm * H * out_isz         # output tile (double buffered)
            + tm * H * 4                   # resident f32 accumulator scratch
            + 3 * tm * 2 * ti * 4)         # f32 MXU result + gelu/up/h temporaries


class GemmaMLPParams(NamedTuple):
    w_gate_up: jax.Array   # [n_i, H, 2*ti]; block ki is contiguous [gate_ki | up_ki]
    w_down_t: jax.Array    # [I_pad, H]
    ti: int                # intermediate tile size
    intermediate_size: int


def prepare_gemma_mlp_params(w_gate, w_up, w_down, *, ti=None, dtype=jnp.bfloat16):
    """One-time weight preparation (do at parameter-load time, NOT per forward).

    w_gate/w_up: [I, H] (PyTorch nn.Linear layout); w_down: [H, I].
    Transposes to row-major matmul layout, zero-pads I up to a multiple of the tile
    (zero columns contribute exactly zero: gelu(0)*0 = 0), and lays gate/up out as a
    contiguous [n_i, H, 2*ti] slab so each per-step weight DMA is one linear transfer.
    Default dtype is bf16 (x is cast to the weight dtype inside gemma_mlp), which keeps
    both matmuls on the fast bf16 MXU path with f32 accumulation.
    """
    I, H = w_gate.shape
    if dtype is not None:
        w_gate = w_gate.astype(dtype)
        w_up = w_up.astype(dtype)
        w_down = w_down.astype(dtype)

    if ti is None:
        # Bigger intermediate tiles on 128 MiB VMEM chips (v5e/v6e); 512 is v7x-safe.
        ti = 1024 if _vmem_budget_bytes() >= (90 << 20) else 512
    ti = min(ti, _round_up(I, 128))     # lane-aligned tile, no bigger than needed
    I_pad = _round_up(I, ti)
    n_i = I_pad // ti

    wg_t = jnp.zeros((H, I_pad), w_gate.dtype).at[:, :I].set(w_gate.T)
    wu_t = jnp.zeros((H, I_pad), w_up.dtype).at[:, :I].set(w_up.T)
    # Per-tile fusion: block ki = [gate_ki | up_ki], stored contiguously as [n_i, H, 2*ti].
    w_gate_up = jnp.concatenate(
        [wg_t.reshape(H, n_i, ti), wu_t.reshape(H, n_i, ti)], axis=-1
    )                                   # [H, n_i, 2*ti]
    w_gate_up = jnp.transpose(w_gate_up, (1, 0, 2))   # [n_i, H, 2*ti]

    w_down_t = jnp.zeros((I_pad, H), w_down.dtype).at[:I, :].set(w_down.T)
    return GemmaMLPParams(w_gate_up, w_down_t, ti, I)


def _gemma_mlp_kernel(x_ref, wgu_ref, wd_ref, o_ref, acc_ref, *, ti):
    ki = pl.program_id(1)

    @pl.when(ki == 0)
    def _():
        acc_ref[...] = jnp.zeros_like(acc_ref)

    x = x_ref[...]                                                  # [tm, H] (weight dtype)
    wgu = wgu_ref[0]                                                # [H, 2*ti]
    gu = jnp.dot(x, wgu, preferred_element_type=jnp.float32)        # [tm, 2*ti] f32
    gate = gu[:, :ti]
    up = gu[:, ti:]
    h = _gelu_tanh(gate) * up                                       # f32 elementwise (EUP tanh)
    acc_ref[...] += jnp.dot(h.astype(wd_ref.dtype), wd_ref[...],
                            preferred_element_type=jnp.float32)     # [tm, H] f32

    @pl.when(ki == pl.num_programs(1) - 1)
    def _():
        o_ref[...] = acc_ref[...].astype(o_ref.dtype)


def gemma_mlp(x, params: GemmaMLPParams, *, tm=None):
    """x: [B, S, H]; params from prepare_gemma_mlp_params."""
    B, S, H = x.shape
    wgu, wd_t, ti, _ = params
    n_i, H_w, two_ti = wgu.shape
    assert H_w == H and two_ti == 2 * ti
    I_pad, _ = wd_t.shape
    assert I_pad == n_i * ti

    out_dtype = x.dtype
    M = B * S

    x_isz = jnp.dtype(wgu.dtype).itemsize     # x is cast to weight dtype below
    w_isz = jnp.dtype(wgu.dtype).itemsize
    out_isz = jnp.dtype(out_dtype).itemsize

    budget = _vmem_budget_bytes()
    margin = 6 << 20

    # Row-tile selection: as large as the VMEM budget allows (amortizes weight
    # re-streaming over M), MXU/lane aligned; sublane-aligned for tiny/decode M.
    if tm is None:
        m_aligned = _round_up(M, 8)
        if m_aligned < 128:
            tm = m_aligned
        else:
            tm = 128
            for cand in (1024, 512, 256, 128):
                if cand > _round_up(M, 128):
                    continue
                if _tile_vmem_bytes(cand, ti, H, x_isz, w_isz, out_isz, 2) + margin <= budget:
                    tm = cand
                    break
    M_pad = _round_up(M, tm)
    n_m = M_pad // tm

    # Deepen weight-stream buffering when the reduction is long and VMEM permits.
    wbuf = 2
    if n_i >= 3 and _tile_vmem_bytes(tm, ti, H, x_isz, w_isz, out_isz, 3) + margin <= budget:
        wbuf = 3

    x2 = x.reshape(M, H).astype(wgu.dtype)     # bf16 x bf16 MXU path by default
    if M_pad != M:
        x2 = jnp.zeros((M_pad, H), x2.dtype).at[:M, :].set(x2)

    est_vmem = _tile_vmem_bytes(tm, ti, H, x_isz, w_isz, out_isz, wbuf)
    vmem_limit = int(min(max(est_vmem + (8 << 20), 32 << 20), budget))

    cost = pl.CostEstimate(
        flops=int(6 * M_pad * H * I_pad),
        transcendentals=int(M_pad * I_pad),
        bytes_accessed=int(x2.size * x_isz
                           + M_pad * H * out_isz
                           + n_m * (wgu.size + wd_t.size) * w_isz),
    )

    wgu_spec_kwargs = dict(pipeline_mode=pl.Buffered(3)) if wbuf == 3 else {}
    wd_spec_kwargs = dict(pipeline_mode=pl.Buffered(3)) if wbuf == 3 else {}

    # TODO(synk): for v7x decode (n_m == 1) split the I reduction across the two
    # TensorCores (core-parallel leading axis + partial-sum add) to use both DMA engines.
    out2 = pl.pallas_call(
        functools.partial(_gemma_mlp_kernel, ti=ti),
        out_shape=jax.ShapeDtypeStruct((M_pad, H), out_dtype),
        grid_spec=pltpu.PrefetchScalarGridSpec(
            num_scalar_prefetch=0,
            grid=(n_m, n_i),
            in_specs=[
                pl.BlockSpec((tm, H), lambda mi, ki: (mi, 0)),        # x tile (resident over ki)
                pl.BlockSpec((1, H, 2 * ti), lambda mi, ki: (ki, 0, 0),
                             **wgu_spec_kwargs),                      # contiguous [gate|up] block
                pl.BlockSpec((ti, H), lambda mi, ki: (ki, 0),
                             **wd_spec_kwargs),                       # down-proj block
            ],
            out_specs=pl.BlockSpec((tm, H), lambda mi, ki: (mi, 0)),
            scratch_shapes=[pltpu.VMEM((tm, H), jnp.float32)],
        ),
        compiler_params=pltpu.CompilerParams(
            dimension_semantics=("parallel", "arbitrary"),
            vmem_limit_bytes=vmem_limit,
        ),
        cost_estimate=cost,
    )(x2, wgu, wd_t)

    return out2[:M].reshape(B, S, H)


def gemma_mlp_ref(x, w_gate, w_up, w_down):
    gate = jnp.einsum("bsh,ih->bsi", x, w_gate)
    up = jnp.einsum("bsh,ih->bsi", x, w_up)
    h = _gelu_tanh(gate) * up
    return jnp.einsum("bsi,hi->bsh", h, w_down)


if __name__ == "__main__":
    B, S, H, I = 2, 8, 32, 64   # batch, seq, hidden_size, intermediate_size

    key = jax.random.PRNGKey(0)
    k_x, k_g, k_u, k_d = jax.random.split(key, 4)
    x = jax.random.normal(k_x, (B, S, H), dtype=jnp.float32)
    w_gate = jax.random.normal(k_g, (I, H), dtype=jnp.float32) * 0.05
    w_up = jax.random.normal(k_u, (I, H), dtype=jnp.float32) * 0.05
    w_down = jax.random.normal(k_d, (H, I), dtype=jnp.float32) * 0.05

    ref = gemma_mlp_ref(x, w_gate, w_up, w_down)

    # 1) f32 weight path: tight check of kernel logic (exact math path).
    params_f32 = prepare_gemma_mlp_params(w_gate, w_up, w_down, dtype=jnp.float32)
    out_f32 = jax.block_until_ready(gemma_mlp(x, params_f32))
    assert out_f32.shape == (B, S, H)
    assert jnp.allclose(out_f32, ref, atol=1e-4, rtol=1e-4), "f32 path mismatch vs reference"

    # 2) Default bf16 MXU path (bf16 weights/activations, f32 accumulation): loose check.
    params_bf16 = prepare_gemma_mlp_params(w_gate, w_up, w_down)
    out_bf16 = jax.block_until_ready(gemma_mlp(x, params_bf16))
    assert out_bf16.shape == (B, S, H)
    assert jnp.allclose(out_bf16, ref, atol=3e-2, rtol=3e-2), "bf16 path mismatch vs reference"

    print("KERNEL_OK")
</pallas_src>

<mosaic_0001>
module attributes {stable_mosaic.version = 11 : i64} {
  func.func @_gemma_mlp_kernel(%arg0: i32, %arg1: i32, %arg2: memref<16x32xf32, #tpu.memory_space<vmem>>, %arg3: memref<1x32x256xf32, #tpu.memory_space<vmem>>, %arg4: memref<128x32xf32, #tpu.memory_space<vmem>>, %arg5: memref<16x32xf32, #tpu.memory_space<vmem>>, %arg6: memref<16x32xf32, #tpu.memory_space<vmem>>) attributes {dimension_semantics = [#tpu.dimension_semantics<parallel>, #tpu.dimension_semantics<arbitrary>], iteration_bounds = array<i64: 1, 1>, scalar_prefetch = 0 : i64, scratch_operands = 1 : i64, tpu.core_type = #tpu.core_type<tc>, window_params = [{transform_indices = @transform_0, window_bounds = array<i64: 16, 32>}, {transform_indices = @transform_1, window_bounds = array<i64: 1, 32, 256>}, {transform_indices = @transform_2, window_bounds = array<i64: 128, 32>}, {transform_indices = @transform_3, window_bounds = array<i64: 16, 32>}]} {
    %c0_i32 = arith.constant 0 : i32
    %0 = arith.cmpi eq, %arg1, %c0_i32 : i32
    %1 = arith.extui %0 : i1 to i32
    %c0_i32_0 = arith.constant 0 : i32
    %2 = arith.cmpi ne, %1, %c0_i32_0 : i32
    scf.if %2 {
      %cst_18 = arith.constant 0.000000e+00 : f32
      %31 = vector.broadcast %cst_18 : f32 to vector<16x32xf32>
      %c0_19 = arith.constant 0 : index
      %c0_20 = arith.constant 0 : index
      %32 = vector.load %arg6[%c0_19, %c0_20] : memref<16x32xf32, #tpu.memory_space<vmem>>, vector<16x32xf32>
      tpu.vector_store %arg6[%c0_19, %c0_20], %31 {strides = array<i32>} : memref<16x32xf32, #tpu.memory_space<vmem>>, vector<16x32xf32>,
    } else {
    }
    %c0 = arith.constant 0 : index
    %c0_1 = arith.constant 0 : index
    %3 = vector.load %arg2[%c0, %c0_1] : memref<16x32xf32, #tpu.memory_space<vmem>>, vector<16x32xf32>
    %c0_2 = arith.constant 0 : index
    %c0_3 = arith.constant 0 : index
    %c0_4 = arith.constant 0 : index
    %4 = vector.load %arg3[%c0_2, %c0_3, %c0_4] : memref<1x32x256xf32, #tpu.memory_space<vmem>>, vector<1x32x256xf32>
    %5 = vector.shape_cast %4 : vector<1x32x256xf32> to vector<32x256xf32>
    %cst = arith.constant dense<0.000000e+00> : vector<16x256xf32>
    %6 = tpu.matmul %3, %5, %cst {dimension_numbers = #tpu.dot_dimension_numbers<[1], [0], [0], [1], [0, 0, 1, 1], [], []>} : vector<16x32xf32>, vector<32x256xf32>, vector<16x256xf32> -> vector<16x256xf32>
    %7 = vector.extract_strided_slice %6 {offsets = [0, 0], sizes = [16, 128], strides = [1, 1]} : vector<16x256xf32> to vector<16x128xf32>
    %8 = vector.extract_strided_slice %6 {offsets = [0, 128], sizes = [16, 128], strides = [1, 1]} : vector<16x256xf32> to vector<16x128xf32>
    %cst_5 = arith.constant 5.000000e-01 : f32
    %9 = vector.broadcast %cst_5 : f32 to vector<16x128xf32>
    %10 = arith.mulf %9, %7 : vector<16x128xf32>
    %cst_6 = arith.constant 4.471500e-02 : f32
    %11 = vector.broadcast %cst_6 : f32 to vector<16x128xf32>
    %12 = arith.mulf %11, %7 : vector<16x128xf32>
    %13 = arith.mulf %12, %7 : vector<16x128xf32>
    %14 = arith.mulf %13, %7 : vector<16x128xf32>
    %15 = arith.addf %7, %14 : vector<16x128xf32>
    %cst_7 = arith.constant 0.797884583 : f32
    %16 = vector.broadcast %cst_7 : f32 to vector<16x128xf32>
    %17 = arith.mulf %16, %15 : vector<16x128xf32>
    %18 = math.tanh %17 : vector<16x128xf32>
    %cst_8 = arith.constant 1.000000e+00 : f32
    %19 = vector.broadcast %cst_8 : f32 to vector<16x128xf32>
    %20 = arith.addf %19, %18 : vector<16x128xf32>
    %21 = arith.mulf %10, %20 : vector<16x128xf32>
    %22 = arith.mulf %21, %8 : vector<16x128xf32>
    %c0_9 = arith.constant 0 : index
    %c0_10 = arith.constant 0 : index
    %23 = vector.load %arg6[%c0_9, %c0_10] : memref<16x32xf32, #tpu.memory_space<vmem>>, vector<16x32xf32>
    %c0_11 = arith.constant 0 : index
    %c0_12 = arith.constant 0 : index
    %24 = vector.load %arg4[%c0_11, %c0_12] : memref<128x32xf32, #tpu.memory_space<vmem>>, vector<128x32xf32>
    %cst_13 = arith.constant dense<0.000000e+00> : vector<16x32xf32>
    %25 = tpu.matmul %22, %24, %cst_13 {dimension_numbers = #tpu.dot_dimension_numbers<[1], [0], [0], [1], [0, 0, 1, 1], [], []>} : vector<16x128xf32>, vector<128x32xf32>, vector<16x32xf32> -> vector<16x32xf32>
    %26 = arith.addf %23, %25 : vector<16x32xf32>
    %c0_14 = arith.constant 0 : index
    %c0_15 = arith.constant 0 : index
    %27 = vector.load %arg6[%c0_14, %c0_15] : memref<16x32xf32, #tpu.memory_space<vmem>>, vector<16x32xf32>
    tpu.vector_store %arg6[%c0_14, %c0_15], %26 {strides = array<i32>} : memref<16x32xf32, #tpu.memory_space<vmem>>, vector<16x32xf32>,
    %c0_i32_16 = arith.constant 0 : i32
    %28 = arith.cmpi eq, %arg1, %c0_i32_16 : i32
    %29 = arith.extui %28 : i1 to i32
    %c0_i32_17 = arith.constant 0 : i32
    %30 = arith.cmpi ne, %29, %c0_i32_17 : i32
    scf.if %30 {
      %c0_18 = arith.constant 0 : index
      %c0_19 = arith.constant 0 : index
      %31 = vector.load %arg6[%c0_18, %c0_19] : memref<16x32xf32, #tpu.memory_space<vmem>>, vector<16x32xf32>
      %c0_20 = arith.constant 0 : index
      %c0_21 = arith.constant 0 : index
      %32 = vector.load %arg5[%c0_20, %c0_21] : memref<16x32xf32, #tpu.memory_space<vmem>>, vector<16x32xf32>
      tpu.vector_store %arg5[%c0_20, %c0_21], %31 {strides = array<i32>} : memref<16x32xf32, #tpu.memory_space<vmem>>, vector<16x32xf32>,
    } else {
    }
    return
  }
  func.func @transform_0(%arg0: i32, %arg1: i32) -> (i32, i32) {
    %c0_i32 = arith.constant 0 : i32
    %c0_i32_0 = arith.constant 0 : i32
    return %arg0, %c0_i32 : i32, i32
  }
  func.func @transform_1(%arg0: i32, %arg1: i32) -> (i32, i32, i32) {
    %c0_i32 = arith.constant 0 : i32
    %c0_i32_0 = arith.constant 0 : i32
    %c0_i32_1 = arith.constant 0 : i32
    return %arg1, %c0_i32, %c0_i32_0 : i32, i32, i32
  }
  func.func @transform_2(%arg0: i32, %arg1: i32) -> (i32, i32) {
    %c0_i32 = arith.constant 0 : i32
    %c0_i32_0 = arith.constant 0 : i32
    return %arg1, %c0_i32 : i32, i32
  }
  func.func @transform_3(%arg0: i32, %arg1: i32) -> (i32, i32) {
    %c0_i32 = arith.constant 0 : i32
    %c0_i32_0 = arith.constant 0 : i32
    return %arg0, %c0_i32 : i32, i32
  }
}

</mosaic_0001>

<bundles_post_ra>
// kernel: tpu_custom_call.1
= control target key start
LH: loop header
LB: loop body
LE: loop exit
PB: predicated region body
PF: predicated region fallthrough
CT: control target
= control target key end

     0   :  { %s344_s0 = inlined_call_operand.vmem [shape: f32[16,32], index: 0, kind: input, shape index: {}]   ;;  %s345_s1 = inlined_call_operand.vmem [shape: f32[1,32,256], index: 1, kind: input, shape index: {}]   ;;  %s346_s2 = inlined_call_operand.vmem [shape: f32[128,32], index: 2, kind: input, shape index: {}]   ;;  %s347_s3 = inlined_call_operand.hbm [shape: f32[16,32], index: 3, kind: output, shape index: {}]  }
   0x1   :  { %v30_v0 = vld [vmem:[%s345_s1 + $0x30] sm:$0xff]  ;;  %v28_v1 = vld [vmem:[%s345_s1 + $0x20] sm:$0xff]  ;;  %v31_v3 = vld [vmem:[%s345_s1 + $0x38] sm:$0xff] }
   0x2   :  { %51 = vmatpush.msra.mxu0 %v30_v0  ;;  %v26_v2 = vld [vmem:[%s345_s1 + $0x10] sm:$0xff]  ;;  %v29_v4 = vld [vmem:[%s345_s1 + $0x28] sm:$0xff]  ;;  %74 = vmatpush.msra.mxu1 %v31_v3  ;;  %v122_v5 = vld [vmem:[%s346_s2 + $0x78] sm:$0xff] }
   0x3   :  { %v121_v6 = vld [vmem:[%s346_s2 + $0x70] sm:$0xff]  ;;  %v24_v7 = vld [vmem:[%s345_s1] sm:$0xff]  ;;  %v27_v8 = vld [vmem:[%s345_s1 + $0x18] sm:$0xff]  ;;  %123 = vmatpush.msra.mxu2 %v122_v5  ;;  %179 = vmatpush.msra.mxu3 %v122_v5 }
   0x4   :  { %52 = vmatpush.msra.mxu0 %v28_v1 }
   0x5   :  { %8 = vsyncpa [#allocation4], 0  ;;  %vm19_vm0 = vcmask 261120   ;;  %v22_v9 = vld [vmem:[%s344_s0] sm:$0xff]  ;;  %75 = vmatpush.msra.mxu1 %v29_v4  ;;  %v120_v10 = vld [vmem:[%s346_s2 + $0x68] sm:$0xff]  ;;  %124 = vmatpush.msra.mxu2 %v121_v6  ;;  %v229_v28 = vmov 0.0  }
   0x6   :  { %53 = vmatpush.msra.mxu0 %v26_v2  ;;  %v25_v11 = vld [vmem:[%s345_s1 + $0x8] sm:$0xff]  ;;  %180 = vmatpush.msra.mxu3 %v121_v6  ;;  %v119_v12 = vld [vmem:[%s346_s2 + $0x60] sm:$0xff]  ;;  %v118_v14 = vld [vmem:[%s346_s2 + $0x58] sm:$0xff]  ;;  %20 = vst.msk [vmem:[#allocation2] sm:$0xff] %vm19_vm0, %v229_v28  ;;  %s163_s11 = sshll.u32 %s347_s3, 4  ;;  %s231_s12 = smov 128   ;;  %s164_s11 = int_to_ptr.hbm [resolvable:$true] %s163_s11 }
   0x7   :  { %76 = vmatpush.msra.mxu1 %v27_v8  ;;  %125 = vmatpush.msra.mxu2 %v120_v10  ;;  %v23_v13 = vld [vmem:[%s344_s0 + $0x8] sm:$0xff]  ;;  %v117_v15 = vld [vmem:[%s346_s2 + $0x50] sm:$0xff]  ;;  %v115_v17 = vld [vmem:[%s346_s2 + $0x40] sm:$0xff]  ;;  %21 = vst.msk [vmem:[#allocation2 + $0x8] sm:$0xff] %vm19_vm0, %v229_v28  ;;  %s232_s1 = smov 8  }
   0x8   :  { %54 = vmatpush.msra.mxu0 %v24_v7  ;;  %181 = vmatpush.msra.mxu3 %v120_v10  ;;  %v116_v16 = vld [vmem:[%s346_s2 + $0x48] sm:$0xff]  ;;  %v114_v18 = vld [vmem:[%s346_s2 + $0x38] sm:$0xff]  ;;  %v113_v19 = vld [vmem:[%s346_s2 + $0x30] sm:$0xff] }
   0x9   :  { %175 = vmatmul.msk.f32.vlgmr.msra.gmra.mxu0 %vm19_vm0, %v22_v9  ;;  %77 = vmatpush.msra.mxu1 %v25_v11  ;;  %v112_v20 = vld [vmem:[%s346_s2 + $0x28] sm:$0xff]  ;;  %v111_v21 = vld [vmem:[%s346_s2 + $0x20] sm:$0xff]  ;;  %v110_v22 = vld [vmem:[%s346_s2 + $0x18] sm:$0xff] }
   0xa   :  { %177 = vmatmul.msk.f32.vlgmr.msra.gmra.mxu1 %vm19_vm0, %v22_v9  ;;  %126 = vmatpush.msra.mxu2 %v119_v12  ;;  %v109_v23 = vld [vmem:[%s346_s2 + $0x10] sm:$0xff]  ;;  %v108_v24 = vld [vmem:[%s346_s2 + $0x8] sm:$0xff]  ;;  %v107_v25 = vld [vmem:[%s346_s2] sm:$0xff]  ;;  %s230_s2 = smov [#allocation3]  }
   0xb   :  { %182 = vmatpush.msra.mxu3 %v119_v12  ;;  %s161_s8 = sshll.u32 %s230_s2, 4  ;;  %s162_s8 = int_to_ptr.vmem [resolvable:$true] %s161_s8 }
   0xc   :  { %127 = vmatpush.msra.mxu2 %v118_v14 }
   0xd   :  { %183 = vmatpush.msra.mxu3 %v118_v14  ;;  %v105_v51 = vld [vmem:[#allocation2] sm:$0xff] }
   0xe   :  { %128 = vmatpush.msra.mxu2 %v117_v15  ;;  %v106_v54 = vld [vmem:[#allocation2 + $0x8] sm:$0xff] }
   0xf   :  { %184 = vmatpush.msra.mxu3 %v117_v15 }
  0x10   :  { %129 = vmatpush.msra.mxu2 %v116_v16 }
  0x11   :  { %176 = vmatmul.msk.f32.gmra.mxu0 %vm19_vm0, %v23_v13  ;;  %185 = vmatpush.msra.mxu3 %v116_v16 }
  0x12   :  { %178 = vmatmul.msk.f32.gmra.mxu1 %vm19_vm0, %v23_v13  ;;  %130 = vmatpush.msra.mxu2 %v115_v17 }
  0x13   :  { %186 = vmatpush.msra.mxu3 %v115_v17 }
  0x14   :  { %131 = vmatpush.msra.mxu2 %v114_v18 }
  0x15   :  { %187 = vmatpush.msra.mxu3 %v114_v18 }
  0x16   :  { %132 = vmatpush.msra.mxu2 %v113_v19 }
  0x17   :  { %188 = vmatpush.msra.mxu3 %v113_v19 }
  0x18   :  { %133 = vmatpush.msra.mxu2 %v112_v20 }
  0x19   :  { %189 = vmatpush.msra.mxu3 %v112_v20 }
  0x1a   :  { %134 = vmatpush.msra.mxu2 %v111_v21 }
  0x1b   :  { %190 = vmatpush.msra.mxu3 %v111_v21 }
  0x1c   :  { %135 = vmatpush.msra.mxu2 %v110_v22 }
  0x1d   :  { %191 = vmatpush.msra.mxu3 %v110_v22 }
  0x1e   :  { %136 = vmatpush.msra.mxu2 %v109_v23 }
  0x1f   :  { %192 = vmatpush.msra.mxu3 %v109_v23 }
  0x20   :  { %137 = vmatpush.msra.mxu2 %v108_v24 }
  0x21   :  { %193 = vmatpush.msra.mxu3 %v108_v24 }
  0x22   :  { %138 = vmatpush.msra.mxu2 %v107_v25 }
  0x23   :  { %194 = vmatpush.msra.mxu3 %v107_v25 }
  0x86   :  { %v56_v26 = vpop.f32.mrf.mxu0 }
  0x87   :  { %v87_v27 = vmul.f32 0.044715, %v56_v26  ;;  %v79_v40 = vpop.f32.mrf.mxu1  ;;  %v85_v41 = vmul.f32 0.5, %v56_v26 }
  0x89   :  { %v89_v29 = vmul.f32 %v87_v27, %v56_v26 }
  0x8b   :  { %v91_v30 = vmul.f32 %v89_v29, %v56_v26 }
  0x8d   :  { %v93_v31 = vadd.f32 %v91_v30, %v56_v26 }
  0x8e   :  { %v59_v32 = vpop.f32.mrf.mxu0 }
  0x8f   :  { %v88_v33 = vmul.f32 0.044715, %v59_v32  ;;  %v95_v34 = vmul.f32 0.7978846, %v93_v31  ;;  %v86_v46 = vmul.f32 0.5, %v59_v32  ;;  %v82_v48 = vpop.f32.mrf.mxu1 }
  0x91   :  { %v90_v35 = vmul.f32 %v88_v33, %v59_v32  ;;  %199 = vtanh.f32 %v95_v34 }
  0x93   :  { %v92_v36 = vmul.f32 %v90_v35, %v59_v32 }
  0x95   :  { %v94_v37 = vadd.f32 %v92_v36, %v59_v32 }
  0x97   :  { %v200_v38 = vpop.eup %199  ;;  %v96_v39 = vmul.f32 0.7978846, %v94_v37 }
  0x98   :  { %v99_v42 = vadd.f32 1.0, %v200_v38 }
  0x99   :  { %201 = vtanh.f32 %v96_v39 }
  0x9a   :  { %v101_v43 = vmul.f32 %v99_v42, %v85_v41 }
  0x9c   :  { %v103_v44 = vmul.f32 %v101_v43, %v79_v40 }
  0x9e   :  { %139 = vmatmul.f32.vlgmr.msra.gmra.mxu2 %v103_v44 }
  0x9f   :  { %v202_v45 = vpop.eup %201 }
  0xa0   :  { %v100_v47 = vadd.f32 1.0, %v202_v45 }
  0xa2   :  { %v102_v49 = vmul.f32 %v100_v47, %v86_v46 }
  0xa4   :  { %v104_v50 = vmul.f32 %v102_v49, %v82_v48 }
  0xa6   :  { %142 = vmatmul.f32.vlgmr.msra.gmra.mxu3 %v104_v50 }
 0x121   :  { %v140_v52 = vpop.f32.mrf.mxu2 }
 0x122   :  { %v146_v53 = vadd.f32 %v140_v52, %v105_v51 }
 0x124   :  { %148 = vst.msk [vmem:[#allocation2] sm:$0xff] %vm19_vm0, %v146_v53 }
 0x129   :  { %v143_v55 = vpop.f32.mrf.mxu3 }
 0x12a   :  { %v147_v56 = vadd.f32 %v143_v55, %v106_v54 }
 0x12b   :  { %v153_v57 = vld [vmem:[#allocation2] sm:$0xff] }
 0x12c   :  { %149 = vst.msk [vmem:[#allocation2 + $0x8] sm:$0xff] %vm19_vm0, %v147_v56 }
 0x12d   :  { %155 = vst.msk [vmem:[#allocation3] sm:$0xff] %vm19_vm0, %v153_v57 }
 0x133   :  { %v154_v58 = vld [vmem:[#allocation2 + $0x8] sm:$0xff] }
 0x134   :  { %156 = vst.msk [vmem:[#allocation3 + $0x8] sm:$0xff] %vm19_vm0, %v154_v58 }
 0x135   :  { %169 = dma.vmem_to_hbm [thread:$0]  %s162_s8, 256, %s164_s11, [#allocation4], %s231_s12, %s231_s12, %s232_s1  }
 0x136   :  { %227 = dma.done.wait [#allocation4], 256  }
 0x137   :  { %228 = vsyncadd [#allocation4], 4294967040 }
 0x138   :  { %174 = vsyncpa [#allocation4], 1 }

</bundles_post_ra>
